<compile_context>
chip_gen: v7x
topology: tpu7x:2x2x1
jax: 0.10.0
libtpu: 0.0.40
codegen_flags: <defaults>
</compile_context>

<pallas_src>
import jax
import jax.numpy as jnp
from jax.experimental import pallas as pl
from jax.experimental.pallas import tpu as pltpu


D_IN_PAD = 128   # input features padded to a full lane width
H1 = 256
H2 = 128
TILE_B = 256     # batch tile: multiple of 8 (sublanes) and 128 (lane-dense out)


# ----------------------------------------------------------------------------
# Pallas kernel: fused 3-layer MLP (BN folded into following linears)
# ----------------------------------------------------------------------------
def taxinet_mlp_kernel(x_ref, w1_ref, b1_ref, w2_ref, b2_ref, w3_ref, b3_ref,
                       out_ref):
    # Layer 1: Linear(d_in_pad, 256) -> ReLU   (bf16 operands, f32 accum)
    h1 = jnp.dot(x_ref[...], w1_ref[...], preferred_element_type=jnp.float32)
    h1 = jnp.maximum(h1 + b1_ref[...], 0.0)
    # BatchNorm1d(256) (eval) folded into w2/b2; Dropout(0.3) = identity.

    # Layer 2: Linear(256, 128) -> ReLU
    h2 = jnp.dot(h1.astype(jnp.bfloat16), w2_ref[...],
                 preferred_element_type=jnp.float32)
    h2 = jnp.maximum(h2 + b2_ref[...], 0.0)
    # BatchNorm1d(128) (eval) folded into w3/b3; Dropout(0.1) = identity.

    # Layer 3: Linear(128, 1), computed as (1,128) @ (128,TILE_B) so the
    # result (and the store) is lane-dense (1, TILE_B), not a masked column.
    out = jnp.dot(w3_ref[...], h2.T, preferred_element_type=jnp.float32)
    out_ref[...] = out + b3_ref[...]


def taxinet_mlp_pallas(x_pad, w1, b1, w2, b2, w3r, b3, *, tile_b=TILE_B):
    Bp, d = x_pad.shape
    assert Bp % tile_b == 0 and d == D_IN_PAD
    grid = (Bp // tile_b,)
    const = lambda i: (0, 0)   # weights/biases: same block every step -> resident

    out = pl.pallas_call(
        taxinet_mlp_kernel,
        out_shape=jax.ShapeDtypeStruct((1, Bp), jnp.float32),
        grid=grid,
        in_specs=[
            pl.BlockSpec((tile_b, D_IN_PAD), lambda i: (i, 0)),   # x tile
            pl.BlockSpec(w1.shape, const),
            pl.BlockSpec(b1.shape, const),
            pl.BlockSpec(w2.shape, const),
            pl.BlockSpec(b2.shape, const),
            pl.BlockSpec(w3r.shape, const),
            pl.BlockSpec(b3.shape, const),
        ],
        out_specs=pl.BlockSpec((1, tile_b), lambda i: (0, i)),    # lane-dense
        compiler_params=pltpu.CompilerParams(
            dimension_semantics=("parallel",),
            vmem_limit_bytes=32 * 1024 * 1024,
        ),
    )(x_pad, w1, b1, w2, b2, w3r, b3)
    return out


# ----------------------------------------------------------------------------
# Parameter prep: fold eval-mode BatchNorm, pad, cast matmul operands to bf16
# ----------------------------------------------------------------------------
def prepare_kernel_params(params, d_in, eps=1e-5):
    assert d_in <= D_IN_PAD
    s1 = params["bn1_gamma"] / jnp.sqrt(params["bn1_var"] + eps)      # (256,)
    t1 = params["bn1_beta"] - params["bn1_mean"] * s1
    s2 = params["bn2_gamma"] / jnp.sqrt(params["bn2_var"] + eps)      # (128,)
    t2 = params["bn2_beta"] - params["bn2_mean"] * s2

    w1 = params["w1"]                                  # (d_in, 256)
    b1 = params["b1"]                                  # (1, 256)  (pre-ReLU; not foldable)
    w2 = s1[:, None] * params["w2"]                    # BN1 scale into w2
    b2 = params["b2"] + (t1 @ params["w2"])[None, :]   # BN1 shift into b2
    w3 = s2[:, None] * params["w3"]                    # BN2 scale into w3
    b3 = params["b3"] + (t2 @ params["w3"])[None, :]   # BN2 shift into b3

    # Zero-pad the ragged input width up to 128 lanes.
    w1p = jnp.zeros((D_IN_PAD, H1), jnp.float32).at[:d_in].set(w1)

    return dict(
        w1=w1p.astype(jnp.bfloat16),
        b1=b1.astype(jnp.float32),
        w2=w2.astype(jnp.bfloat16),
        b2=b2.astype(jnp.float32),
        w3r=w3.T.astype(jnp.float32),                  # (1, 128), final layer in f32
        b3=b3.astype(jnp.float32),                     # (1, 1)
    )


# ----------------------------------------------------------------------------
# TaxiNet forward: embedding gather (plain-JAX glue) + Pallas MLP
# ----------------------------------------------------------------------------
def taxinet_forward(params, x_cat, x_num, *, tile_b=TILE_B):
    # TODO(synk): embedding gather + concat kept as plain-JAX glue (optional
    #             scalar-prefetch fusion into the kernel not implemented).
    embs = [params["emb_tables"][i][x_cat[:, i]]
            for i in range(len(params["emb_tables"]))]
    x = jnp.concatenate(embs + [x_num], axis=1).astype(jnp.float32)
    B, d_in = x.shape

    kp = prepare_kernel_params(params, d_in)

    # Pad features to 128 lanes and batch to a multiple of the batch tile.
    Bp = pl.cdiv(B, tile_b) * tile_b
    x_pad = jnp.zeros((Bp, D_IN_PAD), jnp.float32).at[:B, :d_in].set(x)
    x_pad = x_pad.astype(jnp.bfloat16)

    out = taxinet_mlp_pallas(x_pad, kp["w1"], kp["b1"], kp["w2"], kp["b2"],
                             kp["w3r"], kp["b3"], tile_b=tile_b)
    return out[0, :B]                                  # .squeeze(1)


# ----------------------------------------------------------------------------
# Deterministic parameter init (synthetic; shapes from TaxiNet.__init__)
# ----------------------------------------------------------------------------
def init_params(key, emb_dims, n_num):
    emb_sum = sum(d for _, d in emb_dims)
    d_in = emb_sum + n_num
    keys = jax.random.split(key, 16)

    def lin(k, fan_in, fan_out):
        bound = 1.0 / jnp.sqrt(fan_in)
        kw, kb = jax.random.split(k)
        w = jax.random.uniform(kw, (fan_in, fan_out), jnp.float32, -bound, bound)
        b = jax.random.uniform(kb, (1, fan_out), jnp.float32, -bound, bound)
        return w, b

    emb_tables = [
        jax.random.normal(keys[i], (vocab, dim), jnp.float32)
        for i, (vocab, dim) in enumerate(emb_dims)
    ]
    w1, b1 = lin(keys[8], d_in, H1)
    w2, b2 = lin(keys[9], H1, H2)
    w3, b3 = lin(keys[10], H2, 1)

    return dict(
        emb_tables=emb_tables,
        w1=w1, b1=b1, w2=w2, b2=b2, w3=w3, b3=b3,
        bn1_gamma=jnp.ones((H1,), jnp.float32),
        bn1_beta=jnp.zeros((H1,), jnp.float32),
        bn1_mean=jnp.zeros((H1,), jnp.float32),
        bn1_var=jnp.ones((H1,), jnp.float32),
        bn2_gamma=jnp.ones((H2,), jnp.float32),
        bn2_beta=jnp.zeros((H2,), jnp.float32),
        bn2_mean=jnp.zeros((H2,), jnp.float32),
        bn2_var=jnp.ones((H2,), jnp.float32),
    )


if __name__ == "__main__":
    # 3 categorical columns, emb_dims [(10,4),(20,6),(15,5)] -> emb_sum = 15,
    # n_num = 5 numerical features (d_in = 20), batch = 300 (padded to 512
    # inside the wrapper -> 2 grid steps of TILE_B=256).
    emb_dims = [(10, 4), (20, 6), (15, 5)]
    n_num = 5
    B = 300

    key = jax.random.PRNGKey(0)
    kp_key, kc, kn = jax.random.split(key, 3)

    params = init_params(kp_key, emb_dims, n_num)
    x_cat = jnp.stack(
        [jax.random.randint(jax.random.fold_in(kc, i), (B,), 0, vocab)
         for i, (vocab, _) in enumerate(emb_dims)],
        axis=1,
    ).astype(jnp.int32)                                  # (B, 3) int32
    x_num = jax.random.normal(kn, (B, n_num), jnp.float32)   # (B, 5)

    y = taxinet_forward(params, x_cat, x_num)
    jax.block_until_ready(y)

    # ---------------- pure-JAX references ----------------
    embs = [params["emb_tables"][i][x_cat[:, i]] for i in range(len(emb_dims))]
    x = jnp.concatenate(embs + [x_num], axis=1)
    d_in = x.shape[1]

    # (a) f32 reference of the PyTorch eval-mode forward
    eps = 1e-5
    s1 = params["bn1_gamma"] / jnp.sqrt(params["bn1_var"] + eps)
    t1 = params["bn1_beta"] - params["bn1_mean"] * s1
    s2 = params["bn2_gamma"] / jnp.sqrt(params["bn2_var"] + eps)
    t2 = params["bn2_beta"] - params["bn2_mean"] * s2
    h1 = jnp.maximum(x @ params["w1"] + params["b1"], 0.0) * s1 + t1
    h2 = jnp.maximum(h1 @ params["w2"] + params["b2"], 0.0) * s2 + t2
    y_f32 = (h2 @ params["w3"] + params["b3"])[:, 0]

    # (b) reference mirroring the kernel numerics (bf16 operands, f32 accum)
    kp = prepare_kernel_params(params, d_in)
    xb = jnp.zeros((B, D_IN_PAD), jnp.float32).at[:, :d_in].set(x)
    xb = xb.astype(jnp.bfloat16)
    r1 = jnp.maximum(
        jnp.dot(xb, kp["w1"], preferred_element_type=jnp.float32) + kp["b1"], 0.0)
    r2 = jnp.maximum(
        jnp.dot(r1.astype(jnp.bfloat16), kp["w2"],
                preferred_element_type=jnp.float32) + kp["b2"], 0.0)
    y_bf16 = (r2 @ kp["w3r"].T + kp["b3"])[:, 0]

    assert y.shape == (B,)
    assert jnp.allclose(y, y_bf16, atol=2e-3, rtol=2e-3), "kernel vs bf16 ref mismatch"
    assert jnp.allclose(y, y_f32, atol=5e-2, rtol=5e-2), "kernel vs f32 ref mismatch"
    print("KERNEL_OK")
</pallas_src>

<mosaic_0001>
module attributes {stable_mosaic.version = 11 : i64} {
  func.func @taxinet_mlp_kernel(%arg0: i32, %arg1: memref<256x128xbf16, #tpu.memory_space<vmem>>, %arg2: memref<128x256xbf16, #tpu.memory_space<vmem>>, %arg3: memref<1x256xf32, #tpu.memory_space<vmem>>, %arg4: memref<256x128xbf16, #tpu.memory_space<vmem>>, %arg5: memref<1x128xf32, #tpu.memory_space<vmem>>, %arg6: memref<1x128xf32, #tpu.memory_space<vmem>>, %arg7: memref<1x1xf32, #tpu.memory_space<vmem>>, %arg8: memref<1x256xf32, #tpu.memory_space<vmem>>) attributes {dimension_semantics = [#tpu.dimension_semantics<parallel>], iteration_bounds = array<i64: 2>, scalar_prefetch = 0 : i64, scratch_operands = 0 : i64, tpu.core_type = #tpu.core_type<tc>, window_params = [{transform_indices = @transform_0, window_bounds = array<i64: 256, 128>}, {pipeline_mode = #tpu.pipeline_mode<synchronous>, transform_indices = @transform_1, window_bounds = array<i64: 128, 256>}, {pipeline_mode = #tpu.pipeline_mode<synchronous>, transform_indices = @transform_2, window_bounds = array<i64: 1, 256>}, {pipeline_mode = #tpu.pipeline_mode<synchronous>, transform_indices = @transform_3, window_bounds = array<i64: 256, 128>}, {pipeline_mode = #tpu.pipeline_mode<synchronous>, transform_indices = @transform_4, window_bounds = array<i64: 1, 128>}, {pipeline_mode = #tpu.pipeline_mode<synchronous>, transform_indices = @transform_5, window_bounds = array<i64: 1, 128>}, {pipeline_mode = #tpu.pipeline_mode<synchronous>, transform_indices = @transform_6, window_bounds = array<i64: 1, 1>}, {transform_indices = @transform_7, window_bounds = array<i64: 1, 256>}]} {
    %c0 = arith.constant 0 : index
    %c0_0 = arith.constant 0 : index
    %0 = vector.load %arg1[%c0, %c0_0] : memref<256x128xbf16, #tpu.memory_space<vmem>>, vector<256x128xbf16>
    %c0_1 = arith.constant 0 : index
    %c0_2 = arith.constant 0 : index
    %1 = vector.load %arg2[%c0_1, %c0_2] : memref<128x256xbf16, #tpu.memory_space<vmem>>, vector<128x256xbf16>
    %cst = arith.constant dense<0.000000e+00> : vector<256x256xf32>
    %2 = tpu.matmul %0, %1, %cst {dimension_numbers = #tpu.dot_dimension_numbers<[1], [0], [0], [1], [0, 0, 1, 1], [], []>} : vector<256x128xbf16>, vector<128x256xbf16>, vector<256x256xf32> -> vector<256x256xf32>
    %c0_3 = arith.constant 0 : index
    %c0_4 = arith.constant 0 : index
    %3 = vector.load %arg3[%c0_3, %c0_4] : memref<1x256xf32, #tpu.memory_space<vmem>>, vector<1x256xf32>
    %4 = vector.broadcast %3 : vector<1x256xf32> to vector<256x256xf32>
    %5 = arith.addf %2, %4 : vector<256x256xf32>
    %cst_5 = arith.constant 0.000000e+00 : f32
    %6 = vector.broadcast %cst_5 : f32 to vector<256x256xf32>
    %7 = arith.maximumf %5, %6 : vector<256x256xf32>
    %8 = arith.truncf %7 : vector<256x256xf32> to vector<256x256xbf16>
    %c0_6 = arith.constant 0 : index
    %c0_7 = arith.constant 0 : index
    %9 = vector.load %arg4[%c0_6, %c0_7] : memref<256x128xbf16, #tpu.memory_space<vmem>>, vector<256x128xbf16>
    %cst_8 = arith.constant dense<0.000000e+00> : vector<256x128xf32>
    %10 = tpu.matmul %8, %9, %cst_8 {dimension_numbers = #tpu.dot_dimension_numbers<[1], [0], [0], [1], [0, 0, 1, 1], [], []>} : vector<256x256xbf16>, vector<256x128xbf16>, vector<256x128xf32> -> vector<256x128xf32>
    %c0_9 = arith.constant 0 : index
    %c0_10 = arith.constant 0 : index
    %11 = vector.load %arg5[%c0_9, %c0_10] : memref<1x128xf32, #tpu.memory_space<vmem>>, vector<1x128xf32>
    %12 = vector.broadcast %11 : vector<1x128xf32> to vector<256x128xf32>
    %13 = arith.addf %10, %12 : vector<256x128xf32>
    %cst_11 = arith.constant 0.000000e+00 : f32
    %14 = vector.broadcast %cst_11 : f32 to vector<256x128xf32>
    %15 = arith.maximumf %13, %14 : vector<256x128xf32>
    %c0_12 = arith.constant 0 : index
    %c0_13 = arith.constant 0 : index
    %16 = vector.load %arg6[%c0_12, %c0_13] : memref<1x128xf32, #tpu.memory_space<vmem>>, vector<1x128xf32>
    %17 = tpu.transpose %15, [1, 0] : vector<256x128xf32> -> vector<128x256xf32>
    %cst_14 = arith.constant dense<0.000000e+00> : vector<1x256xf32>
    %18 = tpu.matmul %16, %17, %cst_14 {dimension_numbers = #tpu.dot_dimension_numbers<[1], [0], [0], [1], [0, 0, 1, 1], [], []>} : vector<1x128xf32>, vector<128x256xf32>, vector<1x256xf32> -> vector<1x256xf32>
    %c0_15 = arith.constant 0 : index
    %c0_16 = arith.constant 0 : index
    %19 = vector.load %arg7[%c0_15, %c0_16] : memref<1x1xf32, #tpu.memory_space<vmem>>, vector<1x1xf32>
    %20 = vector.broadcast %19 : vector<1x1xf32> to vector<1x256xf32>
    %21 = arith.addf %18, %20 : vector<1x256xf32>
    %c0_17 = arith.constant 0 : index
    %c0_18 = arith.constant 0 : index
    %22 = vector.load %arg8[%c0_17, %c0_18] : memref<1x256xf32, #tpu.memory_space<vmem>>, vector<1x256xf32>
    tpu.vector_store %arg8[%c0_17, %c0_18], %21 {strides = array<i32>} : memref<1x256xf32, #tpu.memory_space<vmem>>, vector<1x256xf32>,
    return
  }
  func.func @transform_0(%arg0: i32) -> (i32, i32) {
    %c0_i32 = arith.constant 0 : i32
    %c0_i32_0 = arith.constant 0 : i32
    return %arg0, %c0_i32 : i32, i32
  }
  func.func @transform_1(%arg0: i32) -> (i32, i32) {
    %c0_i32 = arith.constant 0 : i32
    %c0_i32_0 = arith.constant 0 : i32
    %c0_i32_1 = arith.constant 0 : i32
    return %c0_i32, %c0_i32_0 : i32, i32
  }
  func.func @transform_2(%arg0: i32) -> (i32, i32) {
    %c0_i32 = arith.constant 0 : i32
    %c0_i32_0 = arith.constant 0 : i32
    %c0_i32_1 = arith.constant 0 : i32
    return %c0_i32, %c0_i32_0 : i32, i32
  }
  func.func @transform_3(%arg0: i32) -> (i32, i32) {
    %c0_i32 = arith.constant 0 : i32
    %c0_i32_0 = arith.constant 0 : i32
    %c0_i32_1 = arith.constant 0 : i32
    return %c0_i32, %c0_i32_0 : i32, i32
  }
  func.func @transform_4(%arg0: i32) -> (i32, i32) {
    %c0_i32 = arith.constant 0 : i32
    %c0_i32_0 = arith.constant 0 : i32
    %c0_i32_1 = arith.constant 0 : i32
    return %c0_i32, %c0_i32_0 : i32, i32
  }
  func.func @transform_5(%arg0: i32) -> (i32, i32) {
    %c0_i32 = arith.constant 0 : i32
    %c0_i32_0 = arith.constant 0 : i32
    %c0_i32_1 = arith.constant 0 : i32
    return %c0_i32, %c0_i32_0 : i32, i32
  }
  func.func @transform_6(%arg0: i32) -> (i32, i32) {
    %c0_i32 = arith.constant 0 : i32
    %c0_i32_0 = arith.constant 0 : i32
    %c0_i32_1 = arith.constant 0 : i32
    return %c0_i32, %c0_i32_0 : i32, i32
  }
  func.func @transform_7(%arg0: i32) -> (i32, i32) {
    %c0_i32 = arith.constant 0 : i32
    %c0_i32_0 = arith.constant 0 : i32
    return %c0_i32, %arg0 : i32, i32
  }
}

</mosaic_0001>

<bundles_post_ra>
// kernel: tpu_custom_call.1
= control target key start
LH: loop header
LB: loop body
LE: loop exit
PB: predicated region body
PF: predicated region fallthrough
CT: control target
= control target key end

     0   :  { %s2405_s0 = inlined_call_operand.hbm [shape: bf16[512,128], index: 0, kind: input, shape index: {}]   ;;  %s2406_s1 = inlined_call_operand.hbm [shape: bf16[128,256], index: 1, kind: input, shape index: {}]   ;;  %s2407_s2 = inlined_call_operand.vmem [shape: f32[1,256], index: 2, kind: input, shape index: {}]   ;;  %s2408_s3 = inlined_call_operand.hbm [shape: bf16[256,128], index: 3, kind: input, shape index: {}]   ;;  %s2409_s4 = inlined_call_operand.vmem [shape: f32[1,128], index: 4, kind: input, shape index: {}]   ;;  %s2410_s5 = inlined_call_operand.vmem [shape: f32[1,128], index: 5, kind: input, shape index: {}]   ;;  %s2411_s6 = inlined_call_operand.<no memory space> [shape: f32[1,1], index: 6, kind: input, shape index: {}]   ;;  %s2412_s7 = inlined_call_operand.hbm [shape: f32[1,512], index: 7, kind: output, shape index: {}]  }
   0x1   :  { %v12_v0 = vstv %s2411_s6 }
   0x2   :  { %13 = vst [vmem:[#allocation2] sm:$0x1] %v12_v0 }
   0x3   :  { %14 = vsyncpa [#allocation4], 0 }
   0x4   :  { %16 = vsyncpa [#allocation4 + $0x1], 0 }
   0x5   :  { %17 = vsyncpa [#allocation7], 0 }
   0x6   :  { %18 = vsyncpa [#allocation5], 0 }
   0x7   :  { %20 = vsyncpa [#allocation5 + $0x1], 0  ;;  %s1981_s26 = smov 0   ;;  %s1983_s27 = smov 0  }
   0x8   :  { %s1985_s28 = smov 0   ;;  %s1987_s29 = smov 0  }
   0x9 LB: > { %s2002_s6 = sadd.s32 4294967295, %s1926_s29   ;;  %s1393_s30 = sadd.s32 4294967294, %s1926_s29   ;;  %s1926_s29 = sphi %s1987_s29, %s2432_s29   ;;  %s1922_s28 = sphi %s1985_s28, %s2431_s28   ;;  %s1918_s27 = sphi %s1983_s27, %s2430_s27   ;;  %s1914_s26 = sphi %s1981_s26, %s2429_s26  }
   0xa   : > { %p46_p0 = scmp.ne.s32.totalorder %s1918_s27, %s1914_s26  ;;  %p2413_p1 = scmp.eq.s32.totalorder %s2002_s6, 0 }
   0xb   : > { %p202_p3 = scmp.eq.s32.totalorder %s1393_s30, 1  ;;  %p1394_p5 = scmp.ge.s32.totalorder %s1926_s29, 1 }
   0xc   : > { %p2011_p4 = por %p2413_p1, %p46_p0  ;;  %p209_p7 = scmp.lt.s32.totalorder %s1926_s29, 3 }
   0xd   : > { %p2016_p6 = por %p202_p3, %p46_p0  ;;  %s1928_s11 = smov [#allocation6]  }
   0xe   : > { %s2416_s8 = scalar_select %p2011_p4, 1, 0 }
   0xf   : > { %s2417_s9 = scalar_select %p2016_p6, 1, 0 }
  0x10   : > { %p2021_p8 = pnand %p1394_p5, %p209_p7  ;;  %s221_s12 = sshll.u32 %s1928_s11, 4  ;;  %s2025_s12 = int_to_ptr.vmem [resolvable:$true] %s221_s12 }
  0x11   : > { %s1929_s14 = smov [#allocation8]   ;;  %s1770_s18 = scalar_lea.hbm %s2406_s1, 2048 }
  0x12   : > { %p1652_p9 = pneg %p2021_p8  ;;  %s237_s15 = sshll.u32 %s1929_s14, 4  ;;  %s2036_s15 = int_to_ptr.vmem [resolvable:$true] %s237_s15 }
  0x13   : > { %p1771_p12 = scmp.ne.s32.totalorder %s2406_s1, %s1770_s18  ;;  %p1777_p5 = scmp.lt.u32.totalorder %s1770_s18, %s2406_s1 }
  0x14   : > { %p2032_p11 = pnand %p1652_p9, %p2413_p1 }
  0x16   : > { %p1772_p13 = pneg %p2032_p11 }
  0x18   : > { %p1773_p0 = pnand %p1772_p13, %p1771_p12 }
  0x1a   : > { %p1774_p3 = pneg %p1773_p0 }
  0x1c   : > { %p1779_p7 = pnand %p1777_p5, %p1774_p3 }
  0x1e   : > { %1782 = shalt.err (!%p1779_p7)
}
  0x1f   : > { %s1783_s23 = scalar_lea.vmem %s2025_s12, 2048  ;;  %p1791_p2 = scmp.lt.s32.totalorder %s2025_s12, %s2025_s12 }
  0x20   : > { %p1784_p9 = scmp.ne.s32.totalorder %s2025_s12, %s1783_s23  ;;  %p1792_p12 = scmp.lt.s32.totalorder %s1783_s23, %s1783_s23 }
  0x22   : > { %p1786_p10 = pnand %p1784_p9, %p1772_p13  ;;  %p1793_p0 = por %p1792_p12, %p1791_p2 }
  0x24   : > { %p1787_p1 = pneg %p1786_p10 }
  0x26   : > { %p1794_p6 = pnand %p1793_p0, %p1787_p1 }
  0x28   : > { %1797 = shalt.err (!%p1794_p6)
}
  0x29   : > { %s1930_s24 = smov 128   ;;  %s1931_s25 = smov 8  }
  0x2a   : > { %1655 = dma.hbm_to_vmem [thread:$0]  (!%p2032_p11), %s2406_s1, 2048, %s2025_s12, [#allocation7], %s1930_s24, %s1930_s24, %s1931_s25  }
  0x2b   : > { %s1798_s17 = scalar_lea.hbm %s2408_s3, 2048 }
  0x2c   : > { %p1799_p2 = scmp.ne.s32.totalorder %s2408_s3, %s1798_s17  ;;  %p1805_p10 = scmp.lt.u32.totalorder %s1798_s17, %s2408_s3 }
  0x2e   : > { %p1801_p1 = pnand %p1799_p2, %p1772_p13 }
  0x30   : > { %p1802_p6 = pneg %p1801_p1 }
  0x32   : > { %p1807_p3 = pnand %p1805_p10, %p1802_p6 }
  0x34   : > { %1810 = shalt.err (!%p1807_p3)
}
  0x35   : > { %s1811_s12 = scalar_lea.vmem %s2036_s15, 2048  ;;  %p1819_p12 = scmp.lt.s32.totalorder %s2036_s15, %s2036_s15 }
  0x36   : > { %p1812_p5 = scmp.ne.s32.totalorder %s2036_s15, %s1811_s12  ;;  %p1820_p0 = scmp.lt.s32.totalorder %s1811_s12, %s1811_s12 }
  0x38   : > { %p1814_p7 = pnand %p1812_p5, %p1772_p13  ;;  %p1821_p2 = por %p1820_p0, %p1819_p12 }
  0x3a   : > { %p1815_p9 = pneg %p1814_p7 }
  0x3c   : > { %p1822_p1 = pnand %p1821_p2, %p1815_p9 }
  0x3e   : > { %1825 = shalt.err (!%p1822_p1)
}
  0x3f   : > { %s1932_s22 = smov 64   ;;  %s1933_s23 = smov 4  }
  0x40   : > { %1658 = dma.hbm_to_vmem [thread:$0]  (!%p2032_p11), %s2408_s3, 2048, %s2036_s15, [#allocation7], %s1932_s22, %s1932_s22, %s1933_s23  }
  0x41   : > { %s2094_s30 = sadd.s32 1, %s1926_s29   ;;  %s33_s14 = sadd.s32 1, %s1922_s28 }
  0x42   : > { %s30_s11 = ssub.s32 %s1926_s29, %s2094_s30  ;;  %p40_p6 = scmp.ne.s32.totalorder %s1922_s28, %s1918_s27 }
  0x43   : > { %p31_p13 = scmp.eq.s32.totalorder %s30_s11, 0  ;;  %p41_p10 = scmp.eq.s32.totalorder %s1926_s29, 0 }
  0x44   : > { %p2420_p5 = scmp.eq.s32.totalorder %s2002_s6, 1  ;;  %p1669_p9 = scmp.lt.s32.totalorder %s1926_s29, 2 }
  0x45   : > { %s2103_s16 = scalar_select %p31_p13, %s1922_s28, %s33_s14  }
  0x46   : > { %p42_p3 = por %p41_p10, %p40_p6  ;;  %p2107_p7 = por %p2420_p5, %p40_p6 }
  0x47   : > { %s260_s17 = sand.u32 1, %s1922_s28   ;;  %s1460_s15 = sshll.u32 %s1926_s29, 11 }
  0x48   : > { %s2421_s13 = scalar_select %p2107_p7, 1, 0 }
  0x49   : > { %s1398_s18 = sshll.u32 %s260_s17, 7  ;;  %s2117_s21 = scalar_lea.hbm %s2405_s0, %s1460_s15 }
  0x4a   : > { %s264_s12 = scalar_lea.vmem [#allocation3], %s1398_s18  ;;  %p2121_p11 = pnand %p1669_p9, %p42_p3 }
  0x4b   : > { %s271_s24 = sshll.u32 %s264_s12, 4  ;;  %s2125_s11 = scalar_lea.sflag [#allocation4], %s260_s17  ;;  %s2119_s24 = int_to_ptr.vmem [resolvable:$true] %s271_s24 }
  0x4c   : > { %s1826_s14 = scalar_lea.hbm %s2117_s21, 2048  ;;  %p1828_p0 = pneg %p2121_p11 }
  0x4d   : > { %p1827_p12 = scmp.ne.s32.totalorder %s2117_s21, %s1826_s14  ;;  %s1831_s19 = scalar_lea.hbm %s2405_s0, 4096 }
  0x4e   : > { %p1832_p13 = scmp.lt.u32.totalorder %s2117_s21, %s2405_s0  ;;  %p1833_p6 = scmp.lt.u32.totalorder %s1831_s19, %s1826_s14 }
  0x4f   : > { %p1829_p2 = pnand %p1828_p0, %p1827_p12  ;;  %p1835_p3 = scmp.lt.u32.totalorder %s1826_s14, %s2117_s21 }
  0x50   : > { %p1834_p10 = por %p1833_p6, %p1832_p13 }
  0x51   : > { %p1830_p1 = pneg %p1829_p2 }
  0x52   : > { %p1836_p5 = por %p1835_p3, %p1834_p10 }
  0x54   : > { %p1837_p9 = pnand %p1836_p5, %p1830_p1 }
  0x56   : > { %1840 = shalt.err (!%p1837_p9)
}
  0x57   : > { %s1841_s17 = scalar_lea.vmem %s2119_s24, 2048  ;;  %s1934_s18 = smov [#allocation3]  }
  0x58   : > { %p1842_p12 = scmp.ne.s32.totalorder %s2119_s24, %s1841_s17  ;;  %s1846_s15 = sshll.u32 %s1934_s18, 4  ;;  %s1847_s15 = int_to_ptr.vmem [resolvable:$false] %s1846_s15 }
  0x59   : > { %s1848_s20 = scalar_lea.vmem %s1847_s15, 4096  ;;  %p1849_p4 = scmp.lt.s32.totalorder %s2119_s24, %s1847_s15 }
  0x5a   : > { %p1844_p2 = pnand %p1842_p12, %p1828_p0  ;;  %p1850_p13 = scmp.lt.s32.totalorder %s1848_s20, %s1841_s17 }
  0x5c   : > { %p1845_p7 = pneg %p1844_p2  ;;  %p1851_p6 = por %p1850_p13, %p1849_p4 }
  0x5e   : > { %p1852_p10 = pnand %p1851_p6, %p1845_p7 }
  0x60   : > { %1855 = shalt.err (!%p1852_p10)
}
  0x61   : > { %1662 = dma.hbm_to_vmem [thread:$0]  (!%p2121_p11), %s2117_s21, 2048, %s2119_s24, %s2125_s11, %s1932_s22, %s1932_s22, %s1933_s23  }
  0x62   : > { %283 = sbr.rel (%p2021_p8) target bundleno = 951 (0x3b7), region = 48  ;;  %s2159_s14 = sand.u32 (!%p2021_p8), 1, %s1918_s27  }
  0x63   : > { %s1402_s19 = sshll.u32 (!%p2021_p8), %s2159_s14, 7  ;;  %s286_s12 = scalar_lea.sflag (!%p2021_p8), [#allocation4], %s2159_s14 }
  0x64   : > { %s2163_s17 = scalar_lea.vmem (!%p2021_p8), [#allocation3], %s1402_s19  ;;  %p2423_p4 = scmp.ne.s32.totalorder (!%p2021_p8), %s2416_s8, 0 }
  0x69   : > { %1901 = dma.done.wait (%p2423_p4), %s286_s12, 2048  }
  0x6a   : > { %1903 = vsyncadd (%p2423_p4), %s286_s12, 4294965248  ;;  %p2424_p7 = scmp.eq.s32.totalorder %s2002_s6, 0 }
  0x6c   : > { %1905 = dma.done.wait (%p2424_p7), [#allocation7], 4096   ;;  %p2425_p8 = pmov %p2424_p7 }
  0x6d   : > { %v1935_v1 = vmov 0   ;;  %v1714_v2 = vld [vmem:[#allocation6 + $0x4] ss:$8 sps:$4 sm:$0xff]   ;;  %v1716_v3 = vld [vmem:[#allocation6] ss:$8 sps:$4 sm:$0xff]   ;;  %v1758_v23 = vld [vmem:[#allocation8 + $0x50] sm:$0xff]   ;;  %v381_v50 = vlaneseq }
  0x6e   : > { %1907 = vsyncadd (%p2425_p8), [#allocation7], 4294963200  ;;  %599 = vmatprep.mubr.bf16.mxu0 %v1935_v1  ;;  %1713 = vset.pattern.permute.xlu0 %v1935_v1  ;;  %v1717_v4 = vld [vmem:[#allocation6 + $0x14] ss:$8 sps:$4 sm:$0xff]   ;;  %v1719_v5 = vld [vmem:[#allocation6 + $0x10] ss:$8 sps:$4 sm:$0xff]  }
  0x6f   : > { %567 = vmatprep.subr.bf16.mxu0 %v1714_v2  ;;  %v1720_v6 = vld [vmem:[#allocation6 + $0x24] ss:$8 sps:$4 sm:$0xff]   ;;  %v1722_v7 = vld [vmem:[#allocation6 + $0x20] ss:$8 sps:$4 sm:$0xff]   ;;  %v1723_v8 = vld [vmem:[#allocation6 + $0x34] ss:$8 sps:$4 sm:$0xff]  }
  0x70   : > { %568 = vmatpush1.bf16.msra.mxu0 %v1716_v3  ;;  %v1725_v9 = vld [vmem:[#allocation6 + $0x30] ss:$8 sps:$4 sm:$0xff]   ;;  %v1726_v10 = vld [vmem:[#allocation6 + $0x44] ss:$8 sps:$4 sm:$0xff]   ;;  %v1728_v11 = vld [vmem:[#allocation6 + $0x40] ss:$8 sps:$4 sm:$0xff]  }
  0x71   : > { %569 = vmatprep.subr.bf16.mxu0 %v1717_v4  ;;  %v1729_v12 = vld [vmem:[#allocation6 + $0x54] ss:$8 sps:$4 sm:$0xff]   ;;  %v1731_v13 = vld [vmem:[#allocation6 + $0x50] ss:$8 sps:$4 sm:$0xff]   ;;  %v1732_v14 = vld [vmem:[#allocation6 + $0x64] ss:$8 sps:$4 sm:$0xff]  }
  0x72   : > { %v1734_v15 = vld [vmem:[#allocation6 + $0x60] ss:$8 sps:$4 sm:$0xff]   ;;  %v1735_v16 = vld [vmem:[#allocation6 + $0x74] ss:$8 sps:$4 sm:$0xff]   ;;  %v1737_v17 = vld [vmem:[#allocation6 + $0x70] ss:$8 sps:$4 sm:$0xff]  }
  0x73   : > { %v1754_v18 = vld [vmem:[#allocation8 + $0x40] sm:$0xff]   ;;  %v1756_v21 = vld [vmem:[#allocation8 + $0x48] sm:$0xff]   ;;  %v1759_v24 = vld [vmem:[#allocation8 + $0x10] sm:$0xff]   ;;  %v2207_v51 = vshrl.u32 %v381_v50, 7  ;;  %s1405_s25 = sshll.u32 %s2159_s14, 1  ;;  %s1461_s11 = sshll.u32 %s2002_s6, 5 }
  0x74   : > { %570 = vmatpush1.bf16.msra.mxu0 %v1719_v5  ;;  %v1738_v19 = vld [vmem:[%s2163_s17] sm:$0xff]   ;;  %1462 = vmatprep.subr.bf16.mxu1 %v1754_v18  ;;  %v1757_v22 = vld [vmem:[#allocation8 + $0x8] sm:$0xff]   ;;  %v1760_v25 = vld [vmem:[#allocation8 + $0x58] sm:$0xff]   ;;  %s327_s18 = scalar_lea.vmem [#allocation9], %s1405_s25  ;;  %vm1286_vm0 = vcmp.lt.s32.totalorder %v381_v50, 256  ;;  %s2361_s12 = scalar_lea.hbm %s2412_s7, %s1461_s11 }
  0x75   : > { %571 = vmatprep.subr.bf16.mxu0 %v1720_v6  ;;  %v1755_v20 = vld [vmem:[#allocation8] sm:$0xff]   ;;  %v1739_v26 = vld [vmem:[%s2163_s17 + $0x8] sm:$0xff]   ;;  %v1761_v27 = vld [vmem:[#allocation8 + $0x18] sm:$0xff]   ;;  %v383_v52 = vsub.s32 0, %v2207_v51  ;;  %v387_v54 = vsub.s32 1, %v2207_v51  ;;  %s1304_s15 = sshll.u32 %s327_s18, 4  ;;  %s2363_s15 = int_to_ptr.vmem [resolvable:$true] %s1304_s15 }
  0x76   : > { %1463 = vmatpush3.bf16.msra.mxu1 %v1755_v20  ;;  %v1762_v28 = vld [vmem:[#allocation8 + $0x60] sm:$0xff]   ;;  %v1764_v30 = vld [vmem:[#allocation8 + $0x68] sm:$0xff]   ;;  %v1740_v31 = vld [vmem:[%s2163_s17 + $0x10] sm:$0xff]   ;;  %s1856_s8 = scalar_lea.vmem %s2363_s15, 32  ;;  %p2426_p0 = scmp.ne.s32.totalorder %s2421_s13, 0 }
  0x77   : > { %1464 = vmatprep.subr.bf16.mxu1 %v1756_v21  ;;  %v1763_v29 = vld [vmem:[#allocation8 + $0x20] sm:$0xff]   ;;  %v1741_v32 = vld [vmem:[%s2163_s17 + $0x18] sm:$0xff]   ;;  %v1743_v34 = vld [vmem:[%s2163_s17 + $0x28] sm:$0xff]   ;;  %p1857_p11 = scmp.ne.s32.totalorder %s2363_s15, %s1856_s8  ;;  %s1937_s6 = smov [#allocation9]  }
  0x78   : > { %572 = vmatpush1.bf16.msra.mxu0 %v1722_v7  ;;  %v1742_v33 = vld [vmem:[%s2163_s17 + $0x20] sm:$0xff]   ;;  %v1744_v35 = vld [vmem:[%s2163_s17 + $0x30] sm:$0xff]   ;;  %v1745_v36 = vld [vmem:[%s2163_s17 + $0x38] sm:$0xff]   ;;  %s1860_s10 = sshll.u32 %s1937_s6, 4  ;;  %s1861_s10 = int_to_ptr.vmem [resolvable:$false] %s1860_s10 }
  0x79   : > { %573 = vmatprep.subr.bf16.mxu0 %v1723_v8  ;;  %v1746_v37 = vld [vmem:[%s2163_s17 + $0x40] sm:$0xff]   ;;  %v1747_v38 = vld [vmem:[%s2163_s17 + $0x48] sm:$0xff]   ;;  %v1748_v39 = vld [vmem:[%s2163_s17 + $0x50] sm:$0xff]   ;;  %p1858_p1 = pnand %p1857_p11, %p2426_p0  ;;  %s1862_s22 = scalar_lea.vmem %s1861_s10, 64 }
  0x7a   : > { %1465 = vmatpush3.bf16.msra.mxu1 %v1757_v22  ;;  %v1765_v40 = vld [vmem:[#allocation8 + $0x28] sm:$0xff]   ;;  %v1749_v41 = vld [vmem:[%s2163_s17 + $0x58] sm:$0xff]   ;;  %v1766_v42 = vld [vmem:[#allocation8 + $0x70] sm:$0xff]   ;;  %p1863_p5 = scmp.lt.s32.totalorder %s2363_s15, %s1861_s10  ;;  %p1864_p9 = scmp.lt.s32.totalorder %s1862_s22, %s1856_s8 }
  0x7b   : > { %1466 = vmatprep.subr.bf16.mxu1 %v1758_v23  ;;  %v1767_v43 = vld [vmem:[#allocation8 + $0x30] sm:$0xff]   ;;  %v1768_v44 = vld [vmem:[#allocation8 + $0x78] sm:$0xff]   ;;  %v1750_v46 = vld [vmem:[%s2163_s17 + $0x60] sm:$0xff]   ;;  %p1859_p3 = pneg %p1858_p1 }
  0x7c   : > { %574 = vmatpush1.bf16.msra.mxu0 %v1725_v9  ;;  %v1769_v45 = vld [vmem:[#allocation8 + $0x38] sm:$0xff]   ;;  %v1751_v47 = vld [vmem:[%s2163_s17 + $0x68] sm:$0xff]   ;;  %v1752_v48 = vld [vmem:[%s2163_s17 + $0x70] sm:$0xff]   ;;  %p1865_p12 = por %p1864_p9, %p1863_p5 }
  0x7d   : > { %575 = vmatprep.subr.bf16.mxu0 %v1726_v10  ;;  %v1753_v49 = vld [vmem:[%s2163_s17 + $0x78] sm:$0xff]   ;;  %s1290_s17 = scalar_lea.sflag [#allocation5], %s2159_s14 }
  0x7e   : > { %1467 = vmatpush3.bf16.msra.mxu1 %v1759_v24  ;;  %v379_v53 = vld [vmem:[%s2407_s2] sm:$0x3]  ;;  %p1866_p2 = pnand %p1865_p12, %p1859_p3 }
  0x7f   : > { %1468 = vmatprep.subr.bf16.mxu1 %v1760_v25  ;;  %v2216_v55 = vrot.slane %v379_v53, %v383_v52  ;;  %v2218_v56 = vrot.slane %v379_v53, %v387_v54 }
  0x80   : > { %576 = vmatpush1.bf16.msra.mxu0 %v1728_v11 }
  0x81   : > { %577 = vmatprep.subr.bf16.mxu0 %v1729_v12 }
  0x82   : > { %1469 = vmatpush3.bf16.msra.mxu1 %v1761_v27 }
  0x83   : > { %1470 = vmatprep.subr.bf16.mxu1 %v1762_v28 }
  0x84   : > { %578 = vmatpush1.bf16.msra.mxu0 %v1731_v13 }
  0x85   : > { %579 = vmatprep.subr.bf16.mxu0 %v1732_v14 }
  0x86   : > { %1471 = vmatpush3.bf16.msra.mxu1 %v1763_v29 }
  0x87   : > { %1472 = vmatprep.subr.bf16.mxu1 %v1764_v30 }
  0x88   : > { %580 = vmatpush1.bf16.msra.mxu0 %v1734_v15 }
  0x89   : > { %581 = vmatprep.subr.bf16.mxu0 %v1735_v16 }
  0x8a   : > { %1473 = vmatpush3.bf16.msra.mxu1 %v1765_v40 }
  0x8b   : > { %1474 = vmatprep.subr.bf16.mxu1 %v1766_v42 }
  0x8c   : > { %582 = vmatpush1.bf16.msra.mxu0 %v1737_v17 }
  0x8e   : > { %1475 = vmatpush3.bf16.msra.mxu1 %v1767_v43 }
  0x8f   : > { %600 = vmatmul.mubr.bf16.vlgmr.msra.gmra.mrb[0].mxu0 %v1738_v19  ;;  %1476 = vmatprep.subr.bf16.mxu1 %v1768_v44 }
  0x90   : > { %609 = vmatprep.mubr.bf16.mxu0 %v1935_v1 }
  0x92   : > { %1477 = vmatpush3.bf16.msra.mxu1 %v1769_v45 }
  0x97   : > { %610 = vmatmul.mubr.bf16.gmra.mrb[4].mxu0 %v1739_v26 }
  0x98   : > { %619 = vmatprep.mubr.bf16.mxu0 %v1935_v1 }
  0x9f   : > { %620 = vmatmul.mubr.bf16.gmra.mrb[8].mxu0 %v1740_v31 }
  0xa0   : > { %629 = vmatprep.mubr.bf16.mxu0 %v1935_v1 }
  0xa7   : > { %630 = vmatmul.mubr.bf16.gmra.mrb[12].mxu0 %v1741_v32 }
  0xa8   : > { %639 = vmatprep.mubr.bf16.mxu0 %v1935_v1 }
  0xaf   : > { %640 = vmatmul.mubr.bf16.gmra.mrb[16].mxu0 %v1742_v33 }
  0xb0   : > { %649 = vmatprep.mubr.bf16.mxu0 %v1935_v1 }
  0xb7   : > { %650 = vmatmul.mubr.bf16.gmra.mrb[20].mxu0 %v1743_v34 }
  0xb8   : > { %659 = vmatprep.mubr.bf16.mxu0 %v1935_v1 }
  0xbf   : > { %660 = vmatmul.mubr.bf16.gmra.mrb[24].mxu0 %v1744_v35 }
  0xc0   : > { %669 = vmatprep.mubr.bf16.mxu0 %v1935_v1 }
  0xc7   : > { %670 = vmatmul.mubr.bf16.gmra.mrb[28].mxu0 %v1745_v36 }
  0xc8   : > { %679 = vmatprep.mubr.bf16.mxu0 %v1935_v1 }
  0xcf   : > { %680 = vmatmul.mubr.bf16.gmra.mrb[32].mxu0 %v1746_v37 }
  0xd0   : > { %689 = vmatprep.mubr.bf16.mxu0 %v1935_v1 }
  0xd7   : > { %690 = vmatmul.mubr.bf16.gmra.mrb[36].mxu0 %v1747_v38 }
  0xd8   : > { %699 = vmatprep.mubr.bf16.mxu0 %v1935_v1 }
  0xdf   : > { %700 = vmatmul.mubr.bf16.gmra.mrb[40].mxu0 %v1748_v39 }
  0xe0   : > { %709 = vmatprep.mubr.bf16.mxu0 %v1935_v1 }
  0xe7   : > { %710 = vmatmul.mubr.bf16.gmra.mrb[44].mxu0 %v1749_v41 }
  0xe8   : > { %719 = vmatprep.mubr.bf16.mxu0 %v1935_v1 }
  0xef   : > { %720 = vmatmul.mubr.bf16.gmra.mrb[48].mxu0 %v1750_v46 }
  0xf0   : > { %729 = vmatprep.mubr.bf16.mxu0 %v1935_v1 }
  0xf7   : > { %730 = vmatmul.mubr.bf16.gmra.mrb[52].mxu0 %v1751_v47 }
  0xf8   : > { %739 = vmatprep.mubr.bf16.mxu0 %v1935_v1 }
  0xff   : > { %740 = vmatmul.mubr.bf16.gmra.mrb[56].mxu0 %v1752_v48 }
 0x100   : > { %749 = vmatprep.mubr.bf16.mxu0 %v1935_v1 }
 0x107   : > { %750 = vmatmul.mubr.bf16.gmra.mrb[60].mxu0 %v1753_v49 }
 0x162   : > { %v601_v57 = vpop.f32.mrb[0].mxu0 }
 0x163   : > { %v602_v58 = vadd.f32 %v601_v57, %v2216_v55  ;;  %v603_v59 = vpop.f32.mrb[1].mxu0 }
 0x164   : > { %v604_v60 = vadd.f32 %v603_v59, %v2218_v56  ;;  %v605_v61 = vpop.f32.mrb[2].mxu0 }
 0x165   : > { %v606_v62 = vadd.f32 %v605_v61, %v2216_v55  ;;  %v607_v63 = vpop.f32.mrb[3].mxu0  ;;  %v760_v1 = vmax.f32 %v602_v58, 0.0 }
 0x166   : > { %v608_v0 = vadd.f32 %v607_v63, %v2218_v56  ;;  %v761_v3 = vmax.f32 %v604_v60, 0.0 }
 0x167   : > { %v762_v2 = vmax.f32 %v606_v62, 0.0 }
 0x168   : > { %v763_v4 = vmax.f32 %v608_v0, 0.0 }
 0x169   : > { %v824_v5 = vpack.c.bf16 %v762_v2, %v760_v1 }
 0x16a   : > { %v611_v6 = vpop.f32.mrb[4].mxu0  ;;  %v825_v7 = vpack.c.bf16 %v763_v4, %v761_v3 }
 0x16b   : > { %v612_v8 = vadd.f32 %v611_v6, %v2216_v55  ;;  %v613_v9 = vpop.f32.mrb[5].mxu0 }
 0x16c   : > { %v614_v10 = vadd.f32 %v613_v9, %v2218_v56  ;;  %v615_v11 = vpop.f32.mrb[6].mxu0  ;;  %1023 = vmatprep.mubr.bf16.mxu1 %v825_v7 }
 0x16d   : > { %v616_v12 = vadd.f32 %v615_v11, %v2216_v55  ;;  %v617_v13 = vpop.f32.mrb[7].mxu0  ;;  %1024 = vmatmul.mubr.bf16.vlgmr.msra.gmra.mrb[0].mxu1 %v824_v5  ;;  %v764_v15 = vmax.f32 %v612_v8, 0.0 }
 0x16e   : > { %v618_v14 = vadd.f32 %v617_v13, %v2218_v56  ;;  %v765_v17 = vmax.f32 %v614_v10, 0.0 }
 0x16f   : > { %v766_v16 = vmax.f32 %v616_v12, 0.0 }
 0x170   : > { %v767_v18 = vmax.f32 %v618_v14, 0.0 }
 0x171   : > { %v826_v19 = vpack.c.bf16 %v766_v16, %v764_v15 }
 0x172   : > { %v827_v20 = vpack.c.bf16 %v767_v18, %v765_v17  ;;  %v621_v21 = vpop.f32.mrb[8].mxu0 }
 0x173   : > { %v622_v22 = vadd.f32 %v621_v21, %v2216_v55  ;;  %v623_v23 = vpop.f32.mrb[9].mxu0 }
 0x174   : > { %v624_v24 = vadd.f32 %v623_v23, %v2218_v56  ;;  %v625_v25 = vpop.f32.mrb[10].mxu0  ;;  %1031 = vmatprep.mubr.bf16.mxu1 %v827_v20 }
 0x175   : > { %v626_v26 = vadd.f32 %v625_v25, %v2216_v55  ;;  %v627_v27 = vpop.f32.mrb[11].mxu0  ;;  %1032 = vmatmul.mubr.bf16.gmra.mrb[4].mxu1 %v826_v19  ;;  %v768_v29 = vmax.f32 %v622_v22, 0.0 }
 0x176   : > { %v628_v28 = vadd.f32 %v627_v27, %v2218_v56  ;;  %v769_v31 = vmax.f32 %v624_v24, 0.0 }
 0x177   : > { %v770_v30 = vmax.f32 %v626_v26, 0.0 }
 0x178   : > { %v771_v32 = vmax.f32 %v628_v28, 0.0 }
 0x179   : > { %v828_v33 = vpack.c.bf16 %v770_v30, %v768_v29 }
 0x17a   : > { %v829_v34 = vpack.c.bf16 %v771_v32, %v769_v31  ;;  %v631_v35 = vpop.f32.mrb[12].mxu0 }
 0x17b   : > { %v632_v36 = vadd.f32 %v631_v35, %v2216_v55  ;;  %v633_v37 = vpop.f32.mrb[13].mxu0 }
 0x17c   : > { %v634_v38 = vadd.f32 %v633_v37, %v2218_v56  ;;  %v635_v39 = vpop.f32.mrb[14].mxu0  ;;  %1039 = vmatprep.mubr.bf16.mxu1 %v829_v34 }
 0x17d   : > { %v636_v40 = vadd.f32 %v635_v39, %v2216_v55  ;;  %v637_v41 = vpop.f32.mrb[15].mxu0  ;;  %1040 = vmatmul.mubr.bf16.gmra.mrb[8].mxu1 %v828_v33  ;;  %v772_v43 = vmax.f32 %v632_v36, 0.0 }
 0x17e   : > { %v638_v42 = vadd.f32 %v637_v41, %v2218_v56  ;;  %v773_v45 = vmax.f32 %v634_v38, 0.0 }
 0x17f   : > { %v774_v44 = vmax.f32 %v636_v40, 0.0 }
 0x180   : > { %v775_v46 = vmax.f32 %v638_v42, 0.0 }
 0x181   : > { %v830_v47 = vpack.c.bf16 %v774_v44, %v772_v43 }
 0x182   : > { %v831_v48 = vpack.c.bf16 %v775_v46, %v773_v45  ;;  %v641_v49 = vpop.f32.mrb[16].mxu0 }
 0x183   : > { %v642_v53 = vadd.f32 %v641_v49, %v2216_v55  ;;  %v643_v54 = vpop.f32.mrb[17].mxu0 }
 0x184   : > { %v644_v57 = vadd.f32 %v643_v54, %v2218_v56  ;;  %v645_v58 = vpop.f32.mrb[18].mxu0  ;;  %1047 = vmatprep.mubr.bf16.mxu1 %v831_v48 }
 0x185   : > { %v646_v59 = vadd.f32 %v645_v58, %v2216_v55  ;;  %v647_v60 = vpop.f32.mrb[19].mxu0  ;;  %1048 = vmatmul.mubr.bf16.gmra.mrb[12].mxu1 %v830_v47  ;;  %v776_v62 = vmax.f32 %v642_v53, 0.0 }
 0x186   : > { %v648_v61 = vadd.f32 %v647_v60, %v2218_v56  ;;  %v777_v0 = vmax.f32 %v644_v57, 0.0 }
 0x187   : > { %v778_v63 = vmax.f32 %v646_v59, 0.0 }
 0x188   : > { %v779_v1 = vmax.f32 %v648_v61, 0.0 }
 0x189   : > { %v832_v2 = vpack.c.bf16 %v778_v63, %v776_v62 }
 0x18a   : > { %v833_v3 = vpack.c.bf16 %v779_v1, %v777_v0  ;;  %v651_v4 = vpop.f32.mrb[20].mxu0 }
 0x18b   : > { %v652_v5 = vadd.f32 %v651_v4, %v2216_v55  ;;  %v653_v6 = vpop.f32.mrb[21].mxu0 }
 0x18c   : > { %v654_v7 = vadd.f32 %v653_v6, %v2218_v56  ;;  %v655_v8 = vpop.f32.mrb[22].mxu0  ;;  %1055 = vmatprep.mubr.bf16.mxu1 %v833_v3 }
 0x18d   : > { %v656_v9 = vadd.f32 %v655_v8, %v2216_v55  ;;  %v657_v10 = vpop.f32.mrb[23].mxu0  ;;  %1056 = vmatmul.mubr.bf16.gmra.mrb[16].mxu1 %v832_v2  ;;  %v780_v12 = vmax.f32 %v652_v5, 0.0 }
 0x18e   : > { %v658_v11 = vadd.f32 %v657_v10, %v2218_v56  ;;  %v781_v14 = vmax.f32 %v654_v7, 0.0 }
 0x18f   : > { %v782_v13 = vmax.f32 %v656_v9, 0.0 }
 0x190   : > { %v783_v15 = vmax.f32 %v658_v11, 0.0 }
 0x191   : > { %v834_v16 = vpack.c.bf16 %v782_v13, %v780_v12 }
 0x192   : > { %v835_v17 = vpack.c.bf16 %v783_v15, %v781_v14  ;;  %v661_v18 = vpop.f32.mrb[24].mxu0 }
 0x193   : > { %v662_v19 = vadd.f32 %v661_v18, %v2216_v55  ;;  %v663_v20 = vpop.f32.mrb[25].mxu0 }
 0x194   : > { %v664_v21 = vadd.f32 %v663_v20, %v2218_v56  ;;  %v665_v22 = vpop.f32.mrb[26].mxu0  ;;  %1063 = vmatprep.mubr.bf16.mxu1 %v835_v17 }
 0x195   : > { %v666_v23 = vadd.f32 %v665_v22, %v2216_v55  ;;  %v667_v24 = vpop.f32.mrb[27].mxu0  ;;  %1064 = vmatmul.mubr.bf16.gmra.mrb[20].mxu1 %v834_v16  ;;  %v784_v26 = vmax.f32 %v662_v19, 0.0 }
 0x196   : > { %v668_v25 = vadd.f32 %v667_v24, %v2218_v56  ;;  %v785_v28 = vmax.f32 %v664_v21, 0.0 }
 0x197   : > { %v786_v27 = vmax.f32 %v666_v23, 0.0 }
 0x198   : > { %v787_v29 = vmax.f32 %v668_v25, 0.0 }
 0x199   : > { %v836_v30 = vpack.c.bf16 %v786_v27, %v784_v26 }
 0x19a   : > { %v837_v31 = vpack.c.bf16 %v787_v29, %v785_v28  ;;  %v671_v32 = vpop.f32.mrb[28].mxu0 }
 0x19b   : > { %v672_v33 = vadd.f32 %v671_v32, %v2216_v55  ;;  %v673_v34 = vpop.f32.mrb[29].mxu0 }
 0x19c   : > { %v674_v35 = vadd.f32 %v673_v34, %v2218_v56  ;;  %v675_v36 = vpop.f32.mrb[30].mxu0  ;;  %1071 = vmatprep.mubr.bf16.mxu1 %v837_v31 }
 0x19d   : > { %v676_v37 = vadd.f32 %v675_v36, %v2216_v55  ;;  %v677_v38 = vpop.f32.mrb[31].mxu0  ;;  %1072 = vmatmul.mubr.bf16.gmra.mrb[24].mxu1 %v836_v30  ;;  %v788_v40 = vmax.f32 %v672_v33, 0.0 }
 0x19e   : > { %v678_v39 = vadd.f32 %v677_v38, %v2218_v56  ;;  %v789_v42 = vmax.f32 %v674_v35, 0.0 }
 0x19f   : > { %v790_v41 = vmax.f32 %v676_v37, 0.0 }
 0x1a0   : > { %v791_v43 = vmax.f32 %v678_v39, 0.0 }
 0x1a1   : > { %v838_v44 = vpack.c.bf16 %v790_v41, %v788_v40 }
 0x1a2   : > { %v839_v45 = vpack.c.bf16 %v791_v43, %v789_v42  ;;  %v681_v46 = vpop.f32.mrb[32].mxu0 }
 0x1a3   : > { %v682_v47 = vadd.f32 %v681_v46, %v2216_v55  ;;  %v683_v48 = vpop.f32.mrb[33].mxu0 }
 0x1a4   : > { %v684_v49 = vadd.f32 %v683_v48, %v2218_v56  ;;  %v685_v53 = vpop.f32.mrb[34].mxu0  ;;  %1079 = vmatprep.mubr.bf16.mxu1 %v839_v45 }
 0x1a5   : > { %v686_v54 = vadd.f32 %v685_v53, %v2216_v55  ;;  %v687_v57 = vpop.f32.mrb[35].mxu0  ;;  %1080 = vmatmul.mubr.bf16.gmra.mrb[28].mxu1 %v838_v44  ;;  %v792_v59 = vmax.f32 %v682_v47, 0.0 }
 0x1a6   : > { %v688_v58 = vadd.f32 %v687_v57, %v2218_v56  ;;  %v793_v61 = vmax.f32 %v684_v49, 0.0 }
 0x1a7   : > { %v794_v60 = vmax.f32 %v686_v54, 0.0 }
 0x1a8   : > { %v795_v62 = vmax.f32 %v688_v58, 0.0 }
 0x1a9   : > { %v840_v63 = vpack.c.bf16 %v794_v60, %v792_v59 }
 0x1aa   : > { %v841_v0 = vpack.c.bf16 %v795_v62, %v793_v61  ;;  %v691_v1 = vpop.f32.mrb[36].mxu0 }
 0x1ab   : > { %v692_v2 = vadd.f32 %v691_v1, %v2216_v55  ;;  %v693_v3 = vpop.f32.mrb[37].mxu0 }
 0x1ac   : > { %v694_v4 = vadd.f32 %v693_v3, %v2218_v56  ;;  %v695_v5 = vpop.f32.mrb[38].mxu0  ;;  %1087 = vmatprep.mubr.bf16.mxu1 %v841_v0 }
 0x1ad   : > { %v696_v6 = vadd.f32 %v695_v5, %v2216_v55  ;;  %v697_v7 = vpop.f32.mrb[39].mxu0  ;;  %1088 = vmatmul.mubr.bf16.gmra.mrb[32].mxu1 %v840_v63  ;;  %v796_v9 = vmax.f32 %v692_v2, 0.0 }
 0x1ae   : > { %v698_v8 = vadd.f32 %v697_v7, %v2218_v56  ;;  %v797_v11 = vmax.f32 %v694_v4, 0.0 }
 0x1af   : > { %v798_v10 = vmax.f32 %v696_v6, 0.0 }
 0x1b0   : > { %v799_v12 = vmax.f32 %v698_v8, 0.0 }
 0x1b1   : > { %v842_v13 = vpack.c.bf16 %v798_v10, %v796_v9 }
 0x1b2   : > { %v843_v14 = vpack.c.bf16 %v799_v12, %v797_v11  ;;  %v701_v15 = vpop.f32.mrb[40].mxu0 }
 0x1b3   : > { %v702_v16 = vadd.f32 %v701_v15, %v2216_v55  ;;  %v703_v17 = vpop.f32.mrb[41].mxu0 }
 0x1b4   : > { %v704_v18 = vadd.f32 %v703_v17, %v2218_v56  ;;  %v705_v19 = vpop.f32.mrb[42].mxu0  ;;  %1095 = vmatprep.mubr.bf16.mxu1 %v843_v14 }
 0x1b5   : > { %v706_v20 = vadd.f32 %v705_v19, %v2216_v55  ;;  %v707_v21 = vpop.f32.mrb[43].mxu0  ;;  %1096 = vmatmul.mubr.bf16.gmra.mrb[36].mxu1 %v842_v13  ;;  %v800_v23 = vmax.f32 %v702_v16, 0.0 }
 0x1b6   : > { %v708_v22 = vadd.f32 %v707_v21, %v2218_v56  ;;  %v801_v25 = vmax.f32 %v704_v18, 0.0 }
 0x1b7   : > { %v802_v24 = vmax.f32 %v706_v20, 0.0 }
 0x1b8   : > { %v803_v26 = vmax.f32 %v708_v22, 0.0 }
 0x1b9   : > { %v844_v27 = vpack.c.bf16 %v802_v24, %v800_v23 }
 0x1ba   : > { %v845_v28 = vpack.c.bf16 %v803_v26, %v801_v25  ;;  %v711_v29 = vpop.f32.mrb[44].mxu0 }
 0x1bb   : > { %v712_v30 = vadd.f32 %v711_v29, %v2216_v55  ;;  %v713_v31 = vpop.f32.mrb[45].mxu0 }
 0x1bc   : > { %v714_v32 = vadd.f32 %v713_v31, %v2218_v56  ;;  %v715_v33 = vpop.f32.mrb[46].mxu0  ;;  %1103 = vmatprep.mubr.bf16.mxu1 %v845_v28 }
 0x1bd   : > { %v716_v34 = vadd.f32 %v715_v33, %v2216_v55  ;;  %v717_v35 = vpop.f32.mrb[47].mxu0  ;;  %1104 = vmatmul.mubr.bf16.gmra.mrb[40].mxu1 %v844_v27  ;;  %v804_v37 = vmax.f32 %v712_v30, 0.0 }
 0x1be   : > { %v718_v36 = vadd.f32 %v717_v35, %v2218_v56  ;;  %v805_v39 = vmax.f32 %v714_v32, 0.0 }
 0x1bf   : > { %v806_v38 = vmax.f32 %v716_v34, 0.0 }
 0x1c0   : > { %v807_v40 = vmax.f32 %v718_v36, 0.0 }
 0x1c1   : > { %v846_v41 = vpack.c.bf16 %v806_v38, %v804_v37 }
 0x1c2   : > { %v847_v42 = vpack.c.bf16 %v807_v40, %v805_v39  ;;  %v721_v43 = vpop.f32.mrb[48].mxu0 }
 0x1c3   : > { %v722_v44 = vadd.f32 %v721_v43, %v2216_v55  ;;  %v723_v45 = vpop.f32.mrb[49].mxu0 }
 0x1c4   : > { %v724_v46 = vadd.f32 %v723_v45, %v2218_v56  ;;  %v725_v47 = vpop.f32.mrb[50].mxu0  ;;  %1111 = vmatprep.mubr.bf16.mxu1 %v847_v42 }
 0x1c5   : > { %v726_v48 = vadd.f32 %v725_v47, %v2216_v55  ;;  %v727_v49 = vpop.f32.mrb[51].mxu0  ;;  %1112 = vmatmul.mubr.bf16.gmra.mrb[44].mxu1 %v846_v41  ;;  %v808_v54 = vmax.f32 %v722_v44, 0.0  ;;  %v2287_v41 = vld [vmem:[%s2409_s4] ss:$0 sm:$0xff] }
 0x1c6   : > { %v728_v53 = vadd.f32 %v727_v49, %v2218_v56  ;;  %v809_v58 = vmax.f32 %v724_v46, 0.0  ;;  %v2293_v46 = vld [vmem:[%s2410_s5] sm:$0x1] }
 0x1c7   : > { %v810_v57 = vmax.f32 %v726_v48, 0.0  ;;  %1606 = vmatprep.mubr.f32.mxu0 %v2293_v46 }
 0x1c8   : > { %v811_v59 = vmax.f32 %v728_v53, 0.0 }
 0x1c9   : > { %v848_v60 = vpack.c.bf16 %v810_v57, %v808_v54 }
 0x1ca   : > { %v849_v61 = vpack.c.bf16 %v811_v59, %v809_v58  ;;  %v731_v62 = vpop.f32.mrb[52].mxu0 }
 0x1cb   : > { %v732_v63 = vadd.f32 %v731_v62, %v2216_v55  ;;  %v733_v0 = vpop.f32.mrb[53].mxu0 }
 0x1cc   : > { %v734_v1 = vadd.f32 %v733_v0, %v2218_v56  ;;  %v735_v2 = vpop.f32.mrb[54].mxu0  ;;  %1119 = vmatprep.mubr.bf16.mxu1 %v849_v61 }
 0x1cd   : > { %v736_v3 = vadd.f32 %v735_v2, %v2216_v55  ;;  %v737_v4 = vpop.f32.mrb[55].mxu0  ;;  %1120 = vmatmul.mubr.bf16.gmra.mrb[48].mxu1 %v848_v60  ;;  %v812_v6 = vmax.f32 %v732_v63, 0.0  ;;  %v1185_v63 = vld [vmem:[#allocation2] sm:$0x1] }
 0x1ce   : > { %v738_v5 = vadd.f32 %v737_v4, %v2218_v56  ;;  %v813_v8 = vmax.f32 %v734_v1, 0.0  ;;  %1188 = vperm.xlu0 %1713, %v1185_v63  }
 0x1cf   : > { %v814_v7 = vmax.f32 %v736_v3, 0.0 }
 0x1d0   : > { %v815_v9 = vmax.f32 %v738_v5, 0.0 }
 0x1d1   : > { %v850_v10 = vpack.c.bf16 %v814_v7, %v812_v6 }
 0x1d2   : > { %v851_v11 = vpack.c.bf16 %v815_v9, %v813_v8  ;;  %v741_v12 = vpop.f32.mrb[56].mxu0 }
 0x1d3   : > { %v742_v13 = vadd.f32 %v741_v12, %v2216_v55  ;;  %v743_v14 = vpop.f32.mrb[57].mxu0 }
 0x1d4   : > { %v744_v15 = vadd.f32 %v743_v14, %v2218_v56  ;;  %v745_v16 = vpop.f32.mrb[58].mxu0  ;;  %1127 = vmatprep.mubr.bf16.mxu1 %v851_v11 }
 0x1d5   : > { %v746_v17 = vadd.f32 %v745_v16, %v2216_v55  ;;  %v747_v18 = vpop.f32.mrb[59].mxu0  ;;  %1128 = vmatmul.mubr.bf16.gmra.mrb[52].mxu1 %v850_v10  ;;  %v816_v20 = vmax.f32 %v742_v13, 0.0 }
 0x1d6   : > { %v748_v19 = vadd.f32 %v747_v18, %v2218_v56  ;;  %v817_v22 = vmax.f32 %v744_v15, 0.0 }
 0x1d7   : > { %v818_v21 = vmax.f32 %v746_v17, 0.0 }
 0x1d8   : > { %v819_v23 = vmax.f32 %v748_v19, 0.0 }
 0x1d9   : > { %v852_v24 = vpack.c.bf16 %v818_v21, %v816_v20 }
 0x1da   : > { %v853_v25 = vpack.c.bf16 %v819_v23, %v817_v22  ;;  %v751_v26 = vpop.f32.mrb[60].mxu0 }
 0x1db   : > { %v752_v27 = vadd.f32 %v751_v26, %v2216_v55  ;;  %v753_v28 = vpop.f32.mrb[61].mxu0 }
 0x1dc   : > { %v754_v29 = vadd.f32 %v753_v28, %v2218_v56  ;;  %v755_v30 = vpop.f32.mrb[62].mxu0  ;;  %1135 = vmatprep.mubr.bf16.mxu1 %v853_v25 }
 0x1dd   : > { %v756_v31 = vadd.f32 %v755_v30, %v2216_v55  ;;  %v757_v32 = vpop.f32.mrb[63].mxu0  ;;  %1136 = vmatmul.mubr.bf16.gmra.mrb[56].mxu1 %v852_v24  ;;  %v820_v34 = vmax.f32 %v752_v27, 0.0 }
 0x1de   : > { %v758_v33 = vadd.f32 %v757_v32, %v2218_v56  ;;  %v821_v36 = vmax.f32 %v754_v29, 0.0 }
 0x1df   : > { %v822_v35 = vmax.f32 %v756_v31, 0.0 }
 0x1e0   : > { %v823_v37 = vmax.f32 %v758_v33, 0.0 }
 0x1e1   : > { %v854_v38 = vpack.c.bf16 %v822_v35, %v820_v34 }
 0x1e2   : > { %v855_v39 = vpack.c.bf16 %v823_v37, %v821_v36 }
 0x1e4   : > { %1143 = vmatprep.mubr.bf16.mxu1 %v855_v39 }
 0x1e5   : > { %1144 = vmatmul.mubr.bf16.gmra.mrb[60].mxu1 %v854_v38 }
 0x240   : > { %v1478_v40 = vpop.f32.mrb[0].mxu1 }
 0x241   : > { %v1479_v42 = vpop.f32.mrb[1].mxu1 }
 0x242   : > { %v1480_v55 = vadd.f32 %v1479_v42, %v1478_v40  ;;  %v1481_v43 = vpop.f32.mrb[2].mxu1 }
 0x243   : > { %v1482_v44 = vpop.f32.mrb[3].mxu1 }
 0x244   : > { %v1026_v56 = vadd.f32 %v1480_v55, %v2287_v41  ;;  %v1483_v45 = vadd.f32 %v1482_v44, %v1481_v43 }
 0x246   : > { %v1029_v47 = vadd.f32 %v1483_v45, %v2287_v41  ;;  %v1152_v48 = vmax.f32 %v1026_v56, 0.0 }
 0x248   : > { %v1153_v49 = vmax.f32 %v1029_v47, 0.0  ;;  %v1484_v53 = vpop.f32.mrb[4].mxu1 }
 0x249   : > { %v1485_v54 = vpop.f32.mrb[5].mxu1 }
 0x24a   : > { %v2297_v57 = vpack.c.bf16 %v1153_v49, %v1152_v48  ;;  %v1486_v58 = vadd.f32 %v1485_v54, %v1484_v53  ;;  %v1487_v59 = vpop.f32.mrb[6].mxu1 }
 0x24b   : > { %v1488_v60 = vpop.f32.mrb[7].mxu1 }
 0x24c   : > { %v1034_v61 = vadd.f32 %v1486_v58, %v2287_v41  ;;  %v1489_v62 = vadd.f32 %v1488_v60, %v1487_v59 }
 0x24e   : > { %v1037_v0 = vadd.f32 %v1489_v62, %v2287_v41  ;;  %v1154_v1 = vmax.f32 %v1034_v61, 0.0 }
 0x250   : > { %v1155_v2 = vmax.f32 %v1037_v0, 0.0  ;;  %v1490_v3 = vpop.f32.mrb[8].mxu1 }
 0x251   : > { %v1491_v4 = vpop.f32.mrb[9].mxu1 }
 0x252   : > { %v2301_v5 = vpack.c.bf16 %v1155_v2, %v1154_v1  ;;  %v1492_v6 = vadd.f32 %v1491_v4, %v1490_v3  ;;  %v1493_v7 = vpop.f32.mrb[10].mxu1 }
 0x253   : > { %v1494_v8 = vpop.f32.mrb[11].mxu1 }
 0x254   : > { %v1042_v9 = vadd.f32 %v1492_v6, %v2287_v41  ;;  %v1495_v10 = vadd.f32 %v1494_v8, %v1493_v7 }
 0x256   : > { %v1045_v11 = vadd.f32 %v1495_v10, %v2287_v41  ;;  %v1156_v12 = vmax.f32 %v1042_v9, 0.0 }
 0x258   : > { %v1157_v13 = vmax.f32 %v1045_v11, 0.0  ;;  %v1496_v14 = vpop.f32.mrb[12].mxu1 }
 0x259   : > { %v1497_v15 = vpop.f32.mrb[13].mxu1 }
 0x25a   : > { %v2305_v16 = vpack.c.bf16 %v1157_v13, %v1156_v12  ;;  %v1498_v17 = vadd.f32 %v1497_v15, %v1496_v14  ;;  %v1499_v18 = vpop.f32.mrb[14].mxu1 }
 0x25b   : > { %v1500_v19 = vpop.f32.mrb[15].mxu1 }
 0x25c   : > { %v1050_v20 = vadd.f32 %v1498_v17, %v2287_v41  ;;  %v1501_v21 = vadd.f32 %v1500_v19, %v1499_v18 }
 0x25e   : > { %v1053_v22 = vadd.f32 %v1501_v21, %v2287_v41  ;;  %v1158_v23 = vmax.f32 %v1050_v20, 0.0 }
 0x260   : > { %v1159_v24 = vmax.f32 %v1053_v22, 0.0  ;;  %v1502_v25 = vpop.f32.mrb[16].mxu1 }
 0x261   : > { %v1503_v26 = vpop.f32.mrb[17].mxu1 }
 0x262   : > { %v2309_v27 = vpack.c.bf16 %v1159_v24, %v1158_v23  ;;  %v1504_v28 = vadd.f32 %v1503_v26, %v1502_v25  ;;  %v1505_v29 = vpop.f32.mrb[18].mxu1 }
 0x263   : > { %v1506_v30 = vpop.f32.mrb[19].mxu1 }
 0x264   : > { %v1058_v31 = vadd.f32 %v1504_v28, %v2287_v41  ;;  %v1507_v32 = vadd.f32 %v1506_v30, %v1505_v29 }
 0x266   : > { %v1061_v33 = vadd.f32 %v1507_v32, %v2287_v41  ;;  %v1160_v34 = vmax.f32 %v1058_v31, 0.0 }
 0x268   : > { %v1161_v35 = vmax.f32 %v1061_v33, 0.0  ;;  %v1508_v36 = vpop.f32.mrb[20].mxu1 }
 0x269   : > { %v1509_v37 = vpop.f32.mrb[21].mxu1 }
 0x26a   : > { %v2313_v38 = vpack.c.bf16 %v1161_v35, %v1160_v34  ;;  %v1510_v39 = vadd.f32 %v1509_v37, %v1508_v36  ;;  %v1511_v40 = vpop.f32.mrb[22].mxu1 }
 0x26b   : > { %v1512_v42 = vpop.f32.mrb[23].mxu1 }
 0x26c   : > { %v1066_v55 = vadd.f32 %v1510_v39, %v2287_v41  ;;  %v1513_v43 = vadd.f32 %v1512_v42, %v1511_v40 }
 0x26e   : > { %v1069_v44 = vadd.f32 %v1513_v43, %v2287_v41  ;;  %v1162_v56 = vmax.f32 %v1066_v55, 0.0 }
 0x270   : > { %v1163_v45 = vmax.f32 %v1069_v44, 0.0  ;;  %v1514_v47 = vpop.f32.mrb[24].mxu1 }
 0x271   : > { %v1515_v48 = vpop.f32.mrb[25].mxu1 }
 0x272   : > { %v2317_v49 = vpack.c.bf16 %v1163_v45, %v1162_v56  ;;  %v1516_v53 = vadd.f32 %v1515_v48, %v1514_v47  ;;  %v1517_v54 = vpop.f32.mrb[26].mxu1 }
 0x273   : > { %v1518_v58 = vpop.f32.mrb[27].mxu1 }
 0x274   : > { %v1074_v59 = vadd.f32 %v1516_v53, %v2287_v41  ;;  %v1519_v60 = vadd.f32 %v1518_v58, %v1517_v54 }
 0x276   : > { %v1077_v61 = vadd.f32 %v1519_v60, %v2287_v41  ;;  %v1164_v62 = vmax.f32 %v1074_v59, 0.0 }
 0x278   : > { %v1165_v63 = vmax.f32 %v1077_v61, 0.0  ;;  %v1520_v0 = vpop.f32.mrb[28].mxu1 }
 0x279   : > { %v1521_v1 = vpop.f32.mrb[29].mxu1 }
 0x27a   : > { %v2321_v2 = vpack.c.bf16 %v1165_v63, %v1164_v62  ;;  %v1522_v3 = vadd.f32 %v1521_v1, %v1520_v0  ;;  %v1523_v4 = vpop.f32.mrb[30].mxu1 }
 0x27b   : > { %v1524_v6 = vpop.f32.mrb[31].mxu1 }
 0x27c   : > { %v1082_v7 = vadd.f32 %v1522_v3, %v2287_v41  ;;  %v1525_v8 = vadd.f32 %v1524_v6, %v1523_v4 }
 0x27e   : > { %v1085_v9 = vadd.f32 %v1525_v8, %v2287_v41  ;;  %v1166_v10 = vmax.f32 %v1082_v7, 0.0 }
 0x280   : > { %v1167_v11 = vmax.f32 %v1085_v9, 0.0  ;;  %v1526_v12 = vpop.f32.mrb[32].mxu1 }
 0x281   : > { %v1527_v13 = vpop.f32.mrb[33].mxu1 }
 0x282   : > { %v2325_v14 = vpack.c.bf16 %v1167_v11, %v1166_v10  ;;  %v1528_v15 = vadd.f32 %v1527_v13, %v1526_v12  ;;  %v1529_v17 = vpop.f32.mrb[34].mxu1 }
 0x283   : > { %v1530_v18 = vpop.f32.mrb[35].mxu1 }
 0x284   : > { %v1090_v19 = vadd.f32 %v1528_v15, %v2287_v41  ;;  %v1531_v20 = vadd.f32 %v1530_v18, %v1529_v17 }
 0x286   : > { %v1093_v21 = vadd.f32 %v1531_v20, %v2287_v41  ;;  %v1168_v22 = vmax.f32 %v1090_v19, 0.0 }
 0x288   : > { %v1169_v23 = vmax.f32 %v1093_v21, 0.0  ;;  %v1532_v24 = vpop.f32.mrb[36].mxu1 }
 0x289   : > { %v1533_v25 = vpop.f32.mrb[37].mxu1 }
 0x28a   : > { %v1534_v26 = vadd.f32 %v1533_v25, %v1532_v24  ;;  %v1535_v28 = vpop.f32.mrb[38].mxu1  ;;  %v1608_v29 = vpack.c.bf16 %v1169_v23, %v1168_v22 }
 0x28b   : > { %v1536_v30 = vpop.f32.mrb[39].mxu1 }
 0x28c   : > { %v1098_v31 = vadd.f32 %v1534_v26, %v2287_v41  ;;  %v1537_v32 = vadd.f32 %v1536_v30, %v1535_v28  ;;  %1609 = vmatprep.subr.bf16.mxu0 %v1608_v29 }
 0x28d   : > { %1611 = vmatpush3.bf16.xpose.msra.mxu0 %v2297_v57 }
 0x28e   : > { %v1101_v33 = vadd.f32 %v1537_v32, %v2287_v41  ;;  %v1170_v34 = vmax.f32 %v1098_v31, 0.0 }
 0x290   : > { %v1171_v35 = vmax.f32 %v1101_v33, 0.0  ;;  %v1538_v36 = vpop.f32.mrb[40].mxu1 }
 0x291   : > { %v1539_v37 = vpop.f32.mrb[41].mxu1 }
 0x292   : > { %v1540_v39 = vadd.f32 %v1539_v37, %v1538_v36  ;;  %v1541_v40 = vpop.f32.mrb[42].mxu1  ;;  %v1612_v42 = vpack.c.bf16 %v1171_v35, %v1170_v34 }
 0x293   : > { %v1542_v55 = vpop.f32.mrb[43].mxu1 }
 0x294   : > { %v1106_v43 = vadd.f32 %v1540_v39, %v2287_v41  ;;  %v1543_v44 = vadd.f32 %v1542_v55, %v1541_v40  ;;  %1613 = vmatprep.subr.bf16.mxu0 %v1612_v42 }
 0x295   : > { %1615 = vmatpush3.bf16.xpose.msra.mxu0 %v2301_v5 }
 0x296   : > { %v1109_v56 = vadd.f32 %v1543_v44, %v2287_v41  ;;  %v1172_v45 = vmax.f32 %v1106_v43, 0.0 }
 0x298   : > { %v1173_v57 = vmax.f32 %v1109_v56, 0.0  ;;  %v1544_v47 = vpop.f32.mrb[44].mxu1 }
 0x299   : > { %v1545_v48 = vpop.f32.mrb[45].mxu1 }
 0x29a   : > { %v1546_v53 = vadd.f32 %v1545_v48, %v1544_v47  ;;  %v1547_v54 = vpop.f32.mrb[46].mxu1  ;;  %v1616_v58 = vpack.c.bf16 %v1173_v57, %v1172_v45  ;;  %v1189_v57 = vpop.permute.xlu0 %1188  ;;  %v1936_v47 = vmov 1966171168  }
 0x29b   : > { %v1548_v59 = vpop.f32.mrb[47].mxu1  ;;  %v1270_v48 = vunpack.c.l.s4 %v1936_v47 }
 0x29c   : > { %v1114_v60 = vadd.f32 %v1546_v53, %v2287_v41  ;;  %v1549_v61 = vadd.f32 %v1548_v59, %v1547_v54  ;;  %1617 = vmatprep.subr.bf16.mxu0 %v1616_v58  ;;  %v1194_v53 = vrot.slane %v1189_v57, %v383_v52 }
 0x29d   : > { %1619 = vmatpush3.bf16.xpose.msra.mxu0 %v2305_v16  ;;  %v1271_v54 = vunpack.c.0.s8 %v1270_v48 }
 0x29e   : > { %v1117_v62 = vadd.f32 %v1549_v61, %v2287_v41  ;;  %v1174_v63 = vmax.f32 %v1114_v60, 0.0 }
 0x29f   : > { %v1274_v60 = vsub.s32 %v1271_v54, %v2207_v51 }
 0x2a0   : > { %v1175_v5 = vmax.f32 %v1117_v62, 0.0  ;;  %v1550_v0 = vpop.f32.mrb[48].mxu1 }
 0x2a1   : > { %v1551_v1 = vpop.f32.mrb[49].mxu1 }
 0x2a2   : > { %v1552_v3 = vadd.f32 %v1551_v1, %v1550_v0  ;;  %v1553_v4 = vpop.f32.mrb[50].mxu1  ;;  %v1620_v6 = vpack.c.bf16 %v1175_v5, %v1174_v63 }
 0x2a3   : > { %v1554_v7 = vpop.f32.mrb[51].mxu1 }
 0x2a4   : > { %v1122_v8 = vadd.f32 %v1552_v3, %v2287_v41  ;;  %v1555_v9 = vadd.f32 %v1554_v7, %v1553_v4  ;;  %1621 = vmatprep.subr.bf16.mxu0 %v1620_v6 }
 0x2a5   : > { %1623 = vmatpush3.bf16.xpose.msra.mxu0 %v2309_v27 }
 0x2a6   : > { %v1125_v10 = vadd.f32 %v1555_v9, %v2287_v41  ;;  %v1176_v11 = vmax.f32 %v1122_v8, 0.0 }
 0x2a8   : > { %v1177_v16 = vmax.f32 %v1125_v10, 0.0  ;;  %v1556_v12 = vpop.f32.mrb[52].mxu1 }
 0x2a9   : > { %v1557_v13 = vpop.f32.mrb[53].mxu1 }
 0x2aa   : > { %v1558_v15 = vadd.f32 %v1557_v13, %v1556_v12  ;;  %v1559_v17 = vpop.f32.mrb[54].mxu1  ;;  %v1624_v18 = vpack.c.bf16 %v1177_v16, %v1176_v11 }
 0x2ab   : > { %v1560_v19 = vpop.f32.mrb[55].mxu1 }
 0x2ac   : > { %v1130_v20 = vadd.f32 %v1558_v15, %v2287_v41  ;;  %v1561_v21 = vadd.f32 %v1560_v19, %v1559_v17  ;;  %1625 = vmatprep.subr.bf16.mxu0 %v1624_v18 }
 0x2ad   : > { %1627 = vmatpush3.bf16.xpose.msra.mxu0 %v2313_v38 }
 0x2ae   : > { %v1133_v22 = vadd.f32 %v1561_v21, %v2287_v41  ;;  %v1178_v23 = vmax.f32 %v1130_v20, 0.0 }
 0x2b0   : > { %v1179_v27 = vmax.f32 %v1133_v22, 0.0  ;;  %v1562_v24 = vpop.f32.mrb[56].mxu1 }
 0x2b1   : > { %v1563_v25 = vpop.f32.mrb[57].mxu1 }
 0x2b2   : > { %v1564_v26 = vadd.f32 %v1563_v25, %v1562_v24  ;;  %v1565_v28 = vpop.f32.mrb[58].mxu1  ;;  %v1628_v29 = vpack.c.bf16 %v1179_v27, %v1178_v23 }
 0x2b3   : > { %v1566_v30 = vpop.f32.mrb[59].mxu1 }
 0x2b4   : > { %v1138_v31 = vadd.f32 %v1564_v26, %v2287_v41  ;;  %v1567_v32 = vadd.f32 %v1566_v30, %v1565_v28  ;;  %1629 = vmatprep.subr.bf16.mxu0 %v1628_v29 }
 0x2b5   : > { %1631 = vmatpush3.bf16.xpose.msra.mxu0 %v2317_v49 }
 0x2b6   : > { %v1141_v33 = vadd.f32 %v1567_v32, %v2287_v41  ;;  %v1180_v34 = vmax.f32 %v1138_v31, 0.0 }
 0x2b8   : > { %v1181_v38 = vmax.f32 %v1141_v33, 0.0  ;;  %v1568_v35 = vpop.f32.mrb[60].mxu1 }
 0x2b9   : > { %v1569_v36 = vpop.f32.mrb[61].mxu1 }
 0x2ba   : > { %v1570_v37 = vadd.f32 %v1569_v36, %v1568_v35  ;;  %v1571_v39 = vpop.f32.mrb[62].mxu1  ;;  %v1632_v40 = vpack.c.bf16 %v1181_v38, %v1180_v34 }
 0x2bb   : > { %v1572_v42 = vpop.f32.mrb[63].mxu1 }
 0x2bc   : > { %v1146_v55 = vadd.f32 %v1570_v37, %v2287_v41  ;;  %v1573_v43 = vadd.f32 %v1572_v42, %v1571_v39  ;;  %1633 = vmatprep.subr.bf16.mxu0 %v1632_v40 }
 0x2bd   : > { %1635 = vmatpush3.bf16.xpose.msra.mxu0 %v2321_v2 }
 0x2be   : > { %v1149_v44 = vadd.f32 %v1573_v43, %v2287_v41  ;;  %v1182_v49 = vmax.f32 %v1146_v55, 0.0 }
 0x2c0   : > { %v1183_v56 = vmax.f32 %v1149_v44, 0.0 }
 0x2c2   : > { %v1636_v45 = vpack.c.bf16 %v1183_v56, %v1182_v49 }
 0x2c4   : > { %1637 = vmatprep.subr.bf16.mxu0 %v1636_v45 }
 0x2c5   : > { %1639 = vmatpush3.bf16.xpose.msra.mxu0 %v2325_v14 }
 0x2cc   : > { %1607 = vmatmul.mubr.f32.vlgmr.msra.gmra.mrb[64].mxu0 %v2293_v46 }
 0x39f   : > { %v1261_v2 = vpop.f32.mrb[64].mxu0 }
 0x3a0   : > { %v1262_v41 = vadd.f32 %v1261_v2, %v1194_v53  ;;  %v1263_v58 = vpop.f32.mrb[65].mxu0 }
 0x3a1   : > { %v1264_v59 = vadd.f32 %v1263_v58, %v1194_v53 }
 0x3a3   : > { %v1268_v61 = vcombine.low %v1262_v41, %v1264_v59 }
 0x3a5   : > { %v1275_v46 = vrot.slane %v1268_v61, %v1274_v60 }
 0x3a7   : > { %v1282_v14 = vrot.slane %v1275_v46, %v1274_v60 }
 0x3a9   : > { %1288 = vst.msk [vmem:[%s327_s18] sm:$0x3] %vm1286_vm0, %v1282_v14 }
 0x3aa   : > { %1869 = shalt.err (!%p1866_p2)
}
 0x3ab   : > { %s1870_s14 = scalar_lea.hbm %s2361_s12, 32  ;;  %s1874_s24 = scalar_lea.hbm %s2412_s7, 64 }
 0x3ac   : > { %p1871_p13 = scmp.ne.s32.totalorder %s2361_s12, %s1870_s14  ;;  %p1875_p4 = scmp.lt.u32.totalorder %s2361_s12, %s2412_s7 }
 0x3ad   : > { %p1876_p7 = scmp.lt.u32.totalorder %s1874_s24, %s1870_s14  ;;  %p1878_p11 = scmp.lt.u32.totalorder %s1870_s14, %s2361_s12 }
 0x3ae   : > { %p1872_p6 = pnand %p1871_p13, %p2426_p0 }
 0x3af   : > { %p1877_p8 = por %p1876_p7, %p1875_p4 }
 0x3b0   : > { %p1873_p10 = pneg %p1872_p6 }
 0x3b1   : > { %p1879_p1 = por %p1878_p11, %p1877_p8 }
 0x3b3   : > { %p1880_p3 = pnand %p1879_p1, %p1873_p10 }
 0x3b5   : > { %1883 = shalt.err (!%p1880_p3)
}
 0x3b6   : > { %1650 = dma.vmem_to_hbm [thread:$0]  (%p2426_p0), %s2363_s15, 32, %s2361_s12, %s1290_s17  }
 0x3b7 PF: > { %s1316_s18 = sand.u32 1, %s1914_s26   ;;  %p2427_p5 = scmp.ne.s32.totalorder %s2417_s9, 0 }
 0x3b8   : > { %p2428_p9 = scmp.ge.s32.totalorder %s1926_s29, 2  ;;  %s1317_s20 = scalar_lea.sflag [#allocation5], %s1316_s18 }
 0x3ba   : > { %p1664_p12 = pnand %p2428_p9, %p2427_p5 }
 0x3bc   : > { %1909 = dma.done.wait (!%p1664_p12), %s1317_s20, 32  }
 0x3bd   : > { %1911 = vsyncadd (!%p1664_p12), %s1317_s20, 4294967264  ;;  %p23_p2 = scmp.ge.s32.totalorder %s2094_s30, 4   ;;  %s2429_s26 = smov %s1918_s27 }
 0x3be   : > { %s2430_s27 = smov %s1922_s28  ;;  %s2431_s28 = smov %s2103_s16 }
 0x3bf   : > { %s2432_s29 = smov %s2094_s30  ;;  %25 = sbr.rel (!%p23_p2) target bundleno = 9 (0x9), region = 101 }
 0x3c6   :  { %1322 = vsyncpa [#allocation4], 1 }
 0x3c7   :  { %1324 = vsyncpa [#allocation4 + $0x1], 1 }
 0x3c8   :  { %1325 = vsyncpa [#allocation7], 1 }
 0x3c9   :  { %1326 = vsyncpa [#allocation5], 1 }
 0x3ca   :  { %1328 = vsyncpa [#allocation5 + $0x1], 1 }

</bundles_post_ra>
